<compile_context>
chip_gen: v6e
topology: v6e:2x2x1
jax: 0.10.0
libtpu: 0.0.40
codegen_flags: <defaults>
</compile_context>

<pallas_src>
import functools

import numpy as np

import jax
import jax.numpy as jnp
from jax.experimental import pallas as pl
from jax.experimental.pallas import tpu as pltpu

EPS = 1e-5  # BatchNorm2d default eps


# ------------------------------ fused kernel --------------------------------

def _csp_fused_kernel(masks_ref, x_ref,
                      w1_ref, b1_ref,
                      wr1_ref, br1_ref,
                      wr2_ref, br2_ref,
                      w2_ref, b2_ref,
                      w3_ref, b3_ref,
                      w4a_ref, w4b_ref, b4_ref,
                      o_ref, tapbuf, *, W):
    f32 = jnp.float32
    bf16 = jnp.bfloat16

    def leaky(z, slope):
        return jnp.where(z >= 0, z, slope * z)

    def mm(w_ref, act):
        # bf16 MXU operands (weights pre-cast at fold time), f32 accumulate.
        return jnp.dot(w_ref[...], act.astype(bf16), preferred_element_type=f32)

    x = x_ref[0]                                            # (C1, L) f32
    L = x.shape[1]

    # conv1 (1x1, folded BN) + LeakyReLU(0.01)
    a = leaky(mm(w1_ref, x) + b1_ref[...], 0.01)            # (ch, L)

    # Res.conv1 (1x1, folded BN) + LeakyReLU(0.01)
    r1 = leaky(mm(wr1_ref, a) + br1_ref[...], 0.01)         # (ch_res, L)
    ch_res = r1.shape[0]

    # Res.conv2: 3x3 conv (pad=1).  Each tap is an XLU lane-roll of the
    # flattened activation; image/pad-boundary validity comes from the
    # precomputed host masks.  Taps are stacked along the contraction axis in
    # a VMEM scratch and contracted with ONE (ch, 9*ch_res)@(9*ch_res, L) dot.
    t = 0
    for dy in (-1, 0, 1):
        for dx in (-1, 0, 1):
            off = dy * W + dx
            if off == 0:
                tap = r1
            else:
                tap = (pltpu.roll(r1, shift=(-off) % L, axis=1)
                       * masks_ref[t:t + 1, :])
            tapbuf[t * ch_res:(t + 1) * ch_res, :] = tap
            t += 1
    z3 = mm(wr2_ref, tapbuf[...]) + br2_ref[...]            # (ch, L)
    res = a + leaky(z3, 0.01)                               # Res skip connection

    # conv2 / conv3 (linear 1x1, concat-BN folded in) + LeakyReLU(0.1)
    u1 = leaky(mm(w2_ref, res) + b2_ref[...], 0.1)          # (ch, L)
    u2 = leaky(mm(w3_ref, x) + b3_ref[...], 0.1)            # (ch, L)

    # conv4 (1x1, folded BN) over the *virtual* concat [u1; u2] + LeakyReLU(0.01)
    out = leaky(mm(w4a_ref, u1) + mm(w4b_ref, u2) + b4_ref[...], 0.01)  # (c2, L)
    o_ref[0] = out.astype(o_ref.dtype)


# ------------------------------ wrapper --------------------------------------

_WEIGHT_KEYS = ("w1", "b1", "wr1", "br1", "wr2", "br2",
                "w2", "b2", "w3", "b3", "w4a", "w4b", "b4")


def _edge_masks(H, W, n_img, lpad):
    """(9, lpad) f32 validity masks for the 3x3 taps, tiled over n_img images."""
    hh, ww = np.meshgrid(np.arange(H), np.arange(W), indexing="ij")
    hh = hh.reshape(-1)
    ww = ww.reshape(-1)
    rows = []
    for dy in (-1, 0, 1):
        for dx in (-1, 0, 1):
            valid = ((hh + dy >= 0) & (hh + dy < H) &
                     (ww + dx >= 0) & (ww + dx < W))
            rows.append(valid.astype(np.float32))
    m = np.stack(rows, 0)                          # (9, H*W)
    m = np.tile(m, (1, n_img))                     # (9, n_img*H*W)
    if lpad > m.shape[1]:
        m = np.pad(m, ((0, 0), (0, lpad - m.shape[1])))
    return jnp.asarray(m)


def bottleneck_csp_forward(x_nchw, p):
    """x_nchw: (N, C1, H, W) float32; p: folded params from fold_params()."""
    N, C1, H, W = x_nchw.shape
    HW = H * W
    c2 = p["w4a"].shape[0]
    ch = p["w2"].shape[0]
    ch_res = p["wr1"].shape[0]

    # --- fold as many images as fit a VMEM budget into the lane axis --------
    live_rows = 2 * C1 + 2 * c2 + 5 * ch + 10 * ch_res      # rough live f32 rows
    budget = 12 * 1024 * 1024
    n_img = max(1, min(N, budget // max(4 * HW * live_rows, 1)))
    while N % n_img:                                        # need a divisor of N
        n_img -= 1
    n_chunks = N // n_img
    lc = n_img * HW
    lpad = ((lc + 127) // 128) * 128                        # lane-dense stores

    # Layout plumbing (cheap XLA ops): (N,C1,H,W) -> (n_chunks, C1, lpad)
    xt = (x_nchw.astype(jnp.float32)
          .reshape(n_chunks, n_img, C1, HW)
          .transpose(0, 2, 1, 3)
          .reshape(n_chunks, C1, lc))
    if lpad != lc:
        xt = jnp.pad(xt, ((0, 0), (0, 0), (0, lpad - lc)))

    masks = _edge_masks(H, W, n_img, lpad)
    weights = [p[k] for k in _WEIGHT_KEYS]

    def whole(arr):  # whole-array, VMEM-resident block (same every step)
        return pl.BlockSpec(arr.shape, lambda n, nd=arr.ndim: (0,) * nd)

    out = pl.pallas_call(
        functools.partial(_csp_fused_kernel, W=W),
        out_shape=jax.ShapeDtypeStruct((n_chunks, c2, lpad), jnp.float32),
        grid=(n_chunks,),
        in_specs=[whole(masks),
                  pl.BlockSpec((1, C1, lpad), lambda n: (n, 0, 0))]
                 + [whole(w) for w in weights],
        out_specs=pl.BlockSpec((1, c2, lpad), lambda n: (n, 0, 0)),
        scratch_shapes=[pltpu.VMEM((9 * ch_res, lpad), jnp.float32)],
        compiler_params=pltpu.CompilerParams(
            dimension_semantics=("parallel",),   # v7x: chunks split across both TCs
            # 48 MiB is v7x-safe; raise toward ~100 MiB on v5e/v6e for real shapes.
            vmem_limit_bytes=48 * 1024 * 1024,
        ),
    )(masks, xt, *weights)

    out = out[:, :, :lc].reshape(n_chunks, c2, n_img, HW)
    return out.transpose(0, 2, 1, 3).reshape(N, c2, H, W)


# ------------------------------ parameter plumbing ---------------------------

def _bn_scale_shift(bn):
    gamma, beta, mean, var = bn
    s = gamma / jnp.sqrt(var + EPS)
    return s, beta - mean * s


def make_params(key, c1, c2):
    """Synthetic module parameters in PyTorch layouts (OIHW conv, per-channel BN)."""
    ch = int(0.5 * c2)          # BottleneckCSP hidden width
    ch_res = int(0.5 * ch)      # Res hidden width
    keys = iter(jax.random.split(key, 64))

    def nrm(shape, scale=0.1):
        return scale * jax.random.normal(next(keys), shape, jnp.float32)

    def bn(c):                  # (gamma, beta, running_mean, running_var)
        return (1.0 + nrm((c,)), nrm((c,)), nrm((c,)), 0.5 + jnp.abs(nrm((c,))))

    return {
        # conv1: Conv(c1, ch, 1) = Conv2d + BN + LeakyReLU(0.01)
        "w1": nrm((ch, c1)), "b1": nrm((ch,)), "bn1": bn(ch),
        # Res.conv1: Conv(ch, ch_res, 1)
        "wr1": nrm((ch_res, ch)), "br1": nrm((ch_res,)), "bnr1": bn(ch_res),
        # Res.conv2: Conv(ch_res, ch, 3, pad=1)   (OIHW)
        "wr2": nrm((ch, ch_res, 3, 3)), "br2": nrm((ch,)), "bnr2": bn(ch),
        # conv2 / conv3: raw nn.Conv2d (bias, no BN/act)
        "w2": nrm((ch, ch)), "b2": nrm((ch,)),
        "w3": nrm((ch, c1)), "b3": nrm((ch,)),
        # standalone BN over the 2*ch concat
        "bn_mid": bn(2 * ch),
        # conv4: Conv(2*ch, c2, 1)
        "w4": nrm((c2, 2 * ch)), "b4": nrm((c2,)), "bn4": bn(c2),
    }


def fold_params(raw):
    """Fold every eval-mode BN into the adjacent conv; bf16 matmul weights."""
    bf16 = jnp.bfloat16

    def fold(w, b, bn):                       # w: (Cout, Cin), b: (Cout,)
        s, t = _bn_scale_shift(bn)
        return w * s[:, None], s * b + t

    p = {}
    w, b = fold(raw["w1"], raw["b1"], raw["bn1"])
    p["w1"], p["b1"] = w.astype(bf16), b[:, None]
    w, b = fold(raw["wr1"], raw["br1"], raw["bnr1"])
    p["wr1"], p["br1"] = w.astype(bf16), b[:, None]

    # Res.conv2 (3x3): fold BN, reorder OIHW -> (O, ky, kx, I) -> (O, 9*I) so
    # column block t = (dy+1)*3 + (dx+1) matches the kernel's tap order.
    s, t = _bn_scale_shift(raw["bnr2"])
    w3x3 = raw["wr2"] * s[:, None, None, None]
    ch, ch_res = w3x3.shape[0], w3x3.shape[1]
    p["wr2"] = jnp.transpose(w3x3, (0, 2, 3, 1)).reshape(ch, 9 * ch_res).astype(bf16)
    p["br2"] = (s * raw["br2"] + t)[:, None]

    # conv2 / conv3 are linear; fold the standalone concat-BN straight into
    # them so the kernel never materialises the concat.
    s, t = _bn_scale_shift(raw["bn_mid"])
    p["w2"] = (raw["w2"] * s[:ch, None]).astype(bf16)
    p["b2"] = (s[:ch] * raw["b2"] + t[:ch])[:, None]
    p["w3"] = (raw["w3"] * s[ch:, None]).astype(bf16)
    p["b3"] = (s[ch:] * raw["b3"] + t[ch:])[:, None]

    # conv4: fold its BN, split along input channels into the y1/y2 halves.
    w, b = fold(raw["w4"], raw["b4"], raw["bn4"])
    p["w4a"] = w[:, :ch].astype(bf16)
    p["w4b"] = w[:, ch:].astype(bf16)
    p["b4"] = b[:, None]
    return p


# ------------------------------ pure-JAX reference ---------------------------

def reference_forward(x, raw):
    """Pure-JAX (XLA) f32 reference following the PyTorch module structure."""
    hp = jax.lax.Precision.HIGHEST

    def leaky(z, slope):
        return jnp.where(z >= 0, z, slope * z)

    def bn(z, bn_p):
        s, t = _bn_scale_shift(bn_p)
        return z * s[None, :, None, None] + t[None, :, None, None]

    def conv1x1(z, w, b):
        return (jnp.einsum("oc,nchw->nohw", w, z, precision=hp)
                + b[None, :, None, None])

    a = leaky(bn(conv1x1(x, raw["w1"], raw["b1"]), raw["bn1"]), 0.01)
    r1 = leaky(bn(conv1x1(a, raw["wr1"], raw["br1"]), raw["bnr1"]), 0.01)
    z3 = jax.lax.conv_general_dilated(
        r1, raw["wr2"], (1, 1), "SAME",
        dimension_numbers=("NCHW", "OIHW", "NCHW"), precision=hp)
    z3 = z3 + raw["br2"][None, :, None, None]
    res = a + leaky(bn(z3, raw["bnr2"]), 0.01)              # Res skip connection
    y1 = conv1x1(res, raw["w2"], raw["b2"])                 # conv2 (linear)
    y2 = conv1x1(x, raw["w3"], raw["b3"])                   # conv3 (linear)
    y = jnp.concatenate([y1, y2], axis=1)
    yb = leaky(bn(y, raw["bn_mid"]), 0.1)
    return leaky(bn(conv1x1(yb, raw["w4"], raw["b4"]), raw["bn4"]), 0.01)


# ------------------------------ main ------------------------------------------

if __name__ == "__main__":
    key = jax.random.PRNGKey(0)
    kx, kp = jax.random.split(key)

    N, C1, C2, H, W = 2, 8, 8, 16, 16          # c_hidden = 4, Res hidden = 2
    x = jax.random.normal(kx, (N, C1, H, W), jnp.float32)

    raw = make_params(kp, C1, C2)
    params = fold_params(raw)

    fwd = jax.jit(bottleneck_csp_forward)
    out = jax.block_until_ready(fwd(x, params))

    ref = reference_forward(x, raw)
    assert out.shape == (N, C2, H, W), out.shape
    max_err = float(jnp.max(jnp.abs(out - ref)))
    # Tolerance loosened vs. the f32-dot version: matmul operands are bf16.
    assert jnp.allclose(out, ref, atol=3e-2, rtol=3e-2), max_err

    print("KERNEL_OK")
</pallas_src>

<mosaic_0001>
module attributes {stable_mosaic.version = 11 : i64} {
  func.func @_csp_fused_kernel(%arg0: i32, %arg1: memref<9x512xf32, #tpu.memory_space<vmem>>, %arg2: memref<1x8x512xf32, #tpu.memory_space<vmem>>, %arg3: memref<4x8xbf16, #tpu.memory_space<vmem>>, %arg4: memref<4x1xf32, #tpu.memory_space<vmem>>, %arg5: memref<2x4xbf16, #tpu.memory_space<vmem>>, %arg6: memref<2x1xf32, #tpu.memory_space<vmem>>, %arg7: memref<4x18xbf16, #tpu.memory_space<vmem>>, %arg8: memref<4x1xf32, #tpu.memory_space<vmem>>, %arg9: memref<4x4xbf16, #tpu.memory_space<vmem>>, %arg10: memref<4x1xf32, #tpu.memory_space<vmem>>, %arg11: memref<4x8xbf16, #tpu.memory_space<vmem>>, %arg12: memref<4x1xf32, #tpu.memory_space<vmem>>, %arg13: memref<8x4xbf16, #tpu.memory_space<vmem>>, %arg14: memref<8x4xbf16, #tpu.memory_space<vmem>>, %arg15: memref<8x1xf32, #tpu.memory_space<vmem>>, %arg16: memref<1x8x512xf32, #tpu.memory_space<vmem>>, %arg17: memref<18x512xf32, #tpu.memory_space<vmem>>) attributes {dimension_semantics = [#tpu.dimension_semantics<parallel>], iteration_bounds = array<i64: 1>, scalar_prefetch = 0 : i64, scratch_operands = 1 : i64, tpu.core_type = #tpu.core_type<tc>, window_params = [{pipeline_mode = #tpu.pipeline_mode<synchronous>, transform_indices = @transform_0, window_bounds = array<i64: 9, 512>}, {transform_indices = @transform_1, window_bounds = array<i64: 1, 8, 512>}, {pipeline_mode = #tpu.pipeline_mode<synchronous>, transform_indices = @transform_2, window_bounds = array<i64: 4, 8>}, {pipeline_mode = #tpu.pipeline_mode<synchronous>, transform_indices = @transform_3, window_bounds = array<i64: 4, 1>}, {pipeline_mode = #tpu.pipeline_mode<synchronous>, transform_indices = @transform_4, window_bounds = array<i64: 2, 4>}, {pipeline_mode = #tpu.pipeline_mode<synchronous>, transform_indices = @transform_5, window_bounds = array<i64: 2, 1>}, {pipeline_mode = #tpu.pipeline_mode<synchronous>, transform_indices = @transform_6, window_bounds = array<i64: 4, 18>}, {pipeline_mode = #tpu.pipeline_mode<synchronous>, transform_indices = @transform_7, window_bounds = array<i64: 4, 1>}, {pipeline_mode = #tpu.pipeline_mode<synchronous>, transform_indices = @transform_8, window_bounds = array<i64: 4, 4>}, {pipeline_mode = #tpu.pipeline_mode<synchronous>, transform_indices = @transform_9, window_bounds = array<i64: 4, 1>}, {pipeline_mode = #tpu.pipeline_mode<synchronous>, transform_indices = @transform_10, window_bounds = array<i64: 4, 8>}, {pipeline_mode = #tpu.pipeline_mode<synchronous>, transform_indices = @transform_11, window_bounds = array<i64: 4, 1>}, {pipeline_mode = #tpu.pipeline_mode<synchronous>, transform_indices = @transform_12, window_bounds = array<i64: 8, 4>}, {pipeline_mode = #tpu.pipeline_mode<synchronous>, transform_indices = @transform_13, window_bounds = array<i64: 8, 4>}, {pipeline_mode = #tpu.pipeline_mode<synchronous>, transform_indices = @transform_14, window_bounds = array<i64: 8, 1>}, {transform_indices = @transform_15, window_bounds = array<i64: 1, 8, 512>}]} {
    %c0 = arith.constant 0 : index
    %c0_0 = arith.constant 0 : index
    %c0_1 = arith.constant 0 : index
    %0 = vector.load %arg2[%c0, %c0_0, %c0_1] : memref<1x8x512xf32, #tpu.memory_space<vmem>>, vector<1x8x512xf32>
    %1 = vector.shape_cast %0 : vector<1x8x512xf32> to vector<8x512xf32>
    %c0_2 = arith.constant 0 : index
    %c0_3 = arith.constant 0 : index
    %2 = vector.load %arg3[%c0_2, %c0_3] : memref<4x8xbf16, #tpu.memory_space<vmem>>, vector<4x8xbf16>
    %3 = arith.truncf %1 : vector<8x512xf32> to vector<8x512xbf16>
    %cst = arith.constant dense<0.000000e+00> : vector<4x512xf32>
    %4 = tpu.matmul %2, %3, %cst {dimension_numbers = #tpu.dot_dimension_numbers<[1], [0], [0], [1], [0, 0, 1, 1], [], []>} : vector<4x8xbf16>, vector<8x512xbf16>, vector<4x512xf32> -> vector<4x512xf32>
    %c0_4 = arith.constant 0 : index
    %c0_5 = arith.constant 0 : index
    %5 = vector.load %arg4[%c0_4, %c0_5] : memref<4x1xf32, #tpu.memory_space<vmem>>, vector<4x1xf32>
    %6 = vector.broadcast %5 : vector<4x1xf32> to vector<4x512xf32>
    %7 = arith.addf %4, %6 : vector<4x512xf32>
    %cst_6 = arith.constant 0.000000e+00 : f32
    %8 = vector.broadcast %cst_6 : f32 to vector<4x512xf32>
    %9 = arith.cmpf oge, %7, %8 : vector<4x512xf32>
    %cst_7 = arith.constant 0.00999999977 : f32
    %10 = vector.broadcast %cst_7 : f32 to vector<4x512xf32>
    %11 = arith.mulf %10, %7 : vector<4x512xf32>
    %12 = arith.select %9, %7, %11 : vector<4x512xi1>, vector<4x512xf32>
    %c0_8 = arith.constant 0 : index
    %c0_9 = arith.constant 0 : index
    %13 = vector.load %arg5[%c0_8, %c0_9] : memref<2x4xbf16, #tpu.memory_space<vmem>>, vector<2x4xbf16>
    %14 = arith.truncf %12 : vector<4x512xf32> to vector<4x512xbf16>
    %cst_10 = arith.constant dense<0.000000e+00> : vector<2x512xf32>
    %15 = tpu.matmul %13, %14, %cst_10 {dimension_numbers = #tpu.dot_dimension_numbers<[1], [0], [0], [1], [0, 0, 1, 1], [], []>} : vector<2x4xbf16>, vector<4x512xbf16>, vector<2x512xf32> -> vector<2x512xf32>
    %c0_11 = arith.constant 0 : index
    %c0_12 = arith.constant 0 : index
    %16 = vector.load %arg6[%c0_11, %c0_12] : memref<2x1xf32, #tpu.memory_space<vmem>>, vector<2x1xf32>
    %17 = vector.broadcast %16 : vector<2x1xf32> to vector<2x512xf32>
    %18 = arith.addf %15, %17 : vector<2x512xf32>
    %cst_13 = arith.constant 0.000000e+00 : f32
    %19 = vector.broadcast %cst_13 : f32 to vector<2x512xf32>
    %20 = arith.cmpf oge, %18, %19 : vector<2x512xf32>
    %cst_14 = arith.constant 0.00999999977 : f32
    %21 = vector.broadcast %cst_14 : f32 to vector<2x512xf32>
    %22 = arith.mulf %21, %18 : vector<2x512xf32>
    %23 = arith.select %20, %18, %22 : vector<2x512xi1>, vector<2x512xf32>
    %c17_i32 = arith.constant 17 : i32
    %24 = tpu.dynamic_rotate %23 by %c17_i32 dim 1 : vector<2x512xf32>, i32 -> vector<2x512xf32>
    %c0_15 = arith.constant 0 : index
    %c0_16 = arith.constant 0 : index
    %25 = vector.load %arg1[%c0_15, %c0_16] : memref<9x512xf32, #tpu.memory_space<vmem>>, vector<1x512xf32>
    %26 = vector.broadcast %25 : vector<1x512xf32> to vector<2x512xf32>
    %27 = arith.mulf %24, %26 : vector<2x512xf32>
    %c0_17 = arith.constant 0 : index
    %c0_18 = arith.constant 0 : index
    %28 = vector.load %arg17[%c0_17, %c0_18] : memref<18x512xf32, #tpu.memory_space<vmem>>, vector<2x512xf32>
    tpu.vector_store %arg17[%c0_17, %c0_18], %27 {strides = array<i32>} : memref<18x512xf32, #tpu.memory_space<vmem>>, vector<2x512xf32>,
    %c16_i32 = arith.constant 16 : i32
    %29 = tpu.dynamic_rotate %23 by %c16_i32 dim 1 : vector<2x512xf32>, i32 -> vector<2x512xf32>
    %c1 = arith.constant 1 : index
    %c0_19 = arith.constant 0 : index
    %30 = vector.load %arg1[%c1, %c0_19] : memref<9x512xf32, #tpu.memory_space<vmem>>, vector<1x512xf32>
    %31 = vector.broadcast %30 : vector<1x512xf32> to vector<2x512xf32>
    %32 = arith.mulf %29, %31 : vector<2x512xf32>
    %c2 = arith.constant 2 : index
    %c0_20 = arith.constant 0 : index
    %33 = vector.load %arg17[%c2, %c0_20] : memref<18x512xf32, #tpu.memory_space<vmem>>, vector<2x512xf32>
    tpu.vector_store %arg17[%c2, %c0_20], %32 {strides = array<i32>} : memref<18x512xf32, #tpu.memory_space<vmem>>, vector<2x512xf32>,
    %c15_i32 = arith.constant 15 : i32
    %34 = tpu.dynamic_rotate %23 by %c15_i32 dim 1 : vector<2x512xf32>, i32 -> vector<2x512xf32>
    %c2_21 = arith.constant 2 : index
    %c0_22 = arith.constant 0 : index
    %35 = vector.load %arg1[%c2_21, %c0_22] : memref<9x512xf32, #tpu.memory_space<vmem>>, vector<1x512xf32>
    %36 = vector.broadcast %35 : vector<1x512xf32> to vector<2x512xf32>
    %37 = arith.mulf %34, %36 : vector<2x512xf32>
    %c4 = arith.constant 4 : index
    %c0_23 = arith.constant 0 : index
    %38 = vector.load %arg17[%c4, %c0_23] : memref<18x512xf32, #tpu.memory_space<vmem>>, vector<2x512xf32>
    tpu.vector_store %arg17[%c4, %c0_23], %37 {strides = array<i32>} : memref<18x512xf32, #tpu.memory_space<vmem>>, vector<2x512xf32>,
    %c1_i32 = arith.constant 1 : i32
    %39 = tpu.dynamic_rotate %23 by %c1_i32 dim 1 : vector<2x512xf32>, i32 -> vector<2x512xf32>
    %c3 = arith.constant 3 : index
    %c0_24 = arith.constant 0 : index
    %40 = vector.load %arg1[%c3, %c0_24] : memref<9x512xf32, #tpu.memory_space<vmem>>, vector<1x512xf32>
    %41 = vector.broadcast %40 : vector<1x512xf32> to vector<2x512xf32>
    %42 = arith.mulf %39, %41 : vector<2x512xf32>
    %c6 = arith.constant 6 : index
    %c0_25 = arith.constant 0 : index
    %43 = vector.load %arg17[%c6, %c0_25] : memref<18x512xf32, #tpu.memory_space<vmem>>, vector<2x512xf32>
    tpu.vector_store %arg17[%c6, %c0_25], %42 {strides = array<i32>} : memref<18x512xf32, #tpu.memory_space<vmem>>, vector<2x512xf32>,
    %c8 = arith.constant 8 : index
    %c0_26 = arith.constant 0 : index
    %44 = vector.load %arg17[%c8, %c0_26] : memref<18x512xf32, #tpu.memory_space<vmem>>, vector<2x512xf32>
    tpu.vector_store %arg17[%c8, %c0_26], %23 {strides = array<i32>} : memref<18x512xf32, #tpu.memory_space<vmem>>, vector<2x512xf32>,
    %c511_i32 = arith.constant 511 : i32
    %45 = tpu.dynamic_rotate %23 by %c511_i32 dim 1 : vector<2x512xf32>, i32 -> vector<2x512xf32>
    %c5 = arith.constant 5 : index
    %c0_27 = arith.constant 0 : index
    %46 = vector.load %arg1[%c5, %c0_27] : memref<9x512xf32, #tpu.memory_space<vmem>>, vector<1x512xf32>
    %47 = vector.broadcast %46 : vector<1x512xf32> to vector<2x512xf32>
    %48 = arith.mulf %45, %47 : vector<2x512xf32>
    %c10 = arith.constant 10 : index
    %c0_28 = arith.constant 0 : index
    %49 = vector.load %arg17[%c10, %c0_28] : memref<18x512xf32, #tpu.memory_space<vmem>>, vector<2x512xf32>
    tpu.vector_store %arg17[%c10, %c0_28], %48 {strides = array<i32>} : memref<18x512xf32, #tpu.memory_space<vmem>>, vector<2x512xf32>,
    %c497_i32 = arith.constant 497 : i32
    %50 = tpu.dynamic_rotate %23 by %c497_i32 dim 1 : vector<2x512xf32>, i32 -> vector<2x512xf32>
    %c6_29 = arith.constant 6 : index
    %c0_30 = arith.constant 0 : index
    %51 = vector.load %arg1[%c6_29, %c0_30] : memref<9x512xf32, #tpu.memory_space<vmem>>, vector<1x512xf32>
    %52 = vector.broadcast %51 : vector<1x512xf32> to vector<2x512xf32>
    %53 = arith.mulf %50, %52 : vector<2x512xf32>
    %c12 = arith.constant 12 : index
    %c0_31 = arith.constant 0 : index
    %54 = vector.load %arg17[%c12, %c0_31] : memref<18x512xf32, #tpu.memory_space<vmem>>, vector<2x512xf32>
    tpu.vector_store %arg17[%c12, %c0_31], %53 {strides = array<i32>} : memref<18x512xf32, #tpu.memory_space<vmem>>, vector<2x512xf32>,
    %c496_i32 = arith.constant 496 : i32
    %55 = tpu.dynamic_rotate %23 by %c496_i32 dim 1 : vector<2x512xf32>, i32 -> vector<2x512xf32>
    %c7 = arith.constant 7 : index
    %c0_32 = arith.constant 0 : index
    %56 = vector.load %arg1[%c7, %c0_32] : memref<9x512xf32, #tpu.memory_space<vmem>>, vector<1x512xf32>
    %57 = vector.broadcast %56 : vector<1x512xf32> to vector<2x512xf32>
    %58 = arith.mulf %55, %57 : vector<2x512xf32>
    %c14 = arith.constant 14 : index
    %c0_33 = arith.constant 0 : index
    %59 = vector.load %arg17[%c14, %c0_33] : memref<18x512xf32, #tpu.memory_space<vmem>>, vector<2x512xf32>
    tpu.vector_store %arg17[%c14, %c0_33], %58 {strides = array<i32>} : memref<18x512xf32, #tpu.memory_space<vmem>>, vector<2x512xf32>,
    %c495_i32 = arith.constant 495 : i32
    %60 = tpu.dynamic_rotate %23 by %c495_i32 dim 1 : vector<2x512xf32>, i32 -> vector<2x512xf32>
    %c8_34 = arith.constant 8 : index
    %c0_35 = arith.constant 0 : index
    %61 = vector.load %arg1[%c8_34, %c0_35] : memref<9x512xf32, #tpu.memory_space<vmem>>, vector<1x512xf32>
    %62 = vector.broadcast %61 : vector<1x512xf32> to vector<2x512xf32>
    %63 = arith.mulf %60, %62 : vector<2x512xf32>
    %c16 = arith.constant 16 : index
    %c0_36 = arith.constant 0 : index
    %64 = vector.load %arg17[%c16, %c0_36] : memref<18x512xf32, #tpu.memory_space<vmem>>, vector<2x512xf32>
    tpu.vector_store %arg17[%c16, %c0_36], %63 {strides = array<i32>} : memref<18x512xf32, #tpu.memory_space<vmem>>, vector<2x512xf32>,
    %c0_37 = arith.constant 0 : index
    %c0_38 = arith.constant 0 : index
    %65 = vector.load %arg17[%c0_37, %c0_38] : memref<18x512xf32, #tpu.memory_space<vmem>>, vector<18x512xf32>
    %c0_39 = arith.constant 0 : index
    %c0_40 = arith.constant 0 : index
    %66 = vector.load %arg7[%c0_39, %c0_40] : memref<4x18xbf16, #tpu.memory_space<vmem>>, vector<4x18xbf16>
    %67 = arith.truncf %65 : vector<18x512xf32> to vector<18x512xbf16>
    %cst_41 = arith.constant dense<0.000000e+00> : vector<4x512xf32>
    %68 = tpu.matmul %66, %67, %cst_41 {dimension_numbers = #tpu.dot_dimension_numbers<[1], [0], [0], [1], [0, 0, 1, 1], [], []>} : vector<4x18xbf16>, vector<18x512xbf16>, vector<4x512xf32> -> vector<4x512xf32>
    %c0_42 = arith.constant 0 : index
    %c0_43 = arith.constant 0 : index
    %69 = vector.load %arg8[%c0_42, %c0_43] : memref<4x1xf32, #tpu.memory_space<vmem>>, vector<4x1xf32>
    %70 = vector.broadcast %69 : vector<4x1xf32> to vector<4x512xf32>
    %71 = arith.addf %68, %70 : vector<4x512xf32>
    %cst_44 = arith.constant 0.000000e+00 : f32
    %72 = vector.broadcast %cst_44 : f32 to vector<4x512xf32>
    %73 = arith.cmpf oge, %71, %72 : vector<4x512xf32>
    %cst_45 = arith.constant 0.00999999977 : f32
    %74 = vector.broadcast %cst_45 : f32 to vector<4x512xf32>
    %75 = arith.mulf %74, %71 : vector<4x512xf32>
    %76 = arith.select %73, %71, %75 : vector<4x512xi1>, vector<4x512xf32>
    %77 = arith.addf %12, %76 : vector<4x512xf32>
    %c0_46 = arith.constant 0 : index
    %c0_47 = arith.constant 0 : index
    %78 = vector.load %arg9[%c0_46, %c0_47] : memref<4x4xbf16, #tpu.memory_space<vmem>>, vector<4x4xbf16>
    %79 = arith.truncf %77 : vector<4x512xf32> to vector<4x512xbf16>
    %cst_48 = arith.constant dense<0.000000e+00> : vector<4x512xf32>
    %80 = tpu.matmul %78, %79, %cst_48 {dimension_numbers = #tpu.dot_dimension_numbers<[1], [0], [0], [1], [0, 0, 1, 1], [], []>} : vector<4x4xbf16>, vector<4x512xbf16>, vector<4x512xf32> -> vector<4x512xf32>
    %c0_49 = arith.constant 0 : index
    %c0_50 = arith.constant 0 : index
    %81 = vector.load %arg10[%c0_49, %c0_50] : memref<4x1xf32, #tpu.memory_space<vmem>>, vector<4x1xf32>
    %82 = vector.broadcast %81 : vector<4x1xf32> to vector<4x512xf32>
    %83 = arith.addf %80, %82 : vector<4x512xf32>
    %cst_51 = arith.constant 0.000000e+00 : f32
    %84 = vector.broadcast %cst_51 : f32 to vector<4x512xf32>
    %85 = arith.cmpf oge, %83, %84 : vector<4x512xf32>
    %cst_52 = arith.constant 1.000000e-01 : f32
    %86 = vector.broadcast %cst_52 : f32 to vector<4x512xf32>
    %87 = arith.mulf %86, %83 : vector<4x512xf32>
    %88 = arith.select %85, %83, %87 : vector<4x512xi1>, vector<4x512xf32>
    %c0_53 = arith.constant 0 : index
    %c0_54 = arith.constant 0 : index
    %89 = vector.load %arg11[%c0_53, %c0_54] : memref<4x8xbf16, #tpu.memory_space<vmem>>, vector<4x8xbf16>
    %90 = arith.truncf %1 : vector<8x512xf32> to vector<8x512xbf16>
    %cst_55 = arith.constant dense<0.000000e+00> : vector<4x512xf32>
    %91 = tpu.matmul %89, %90, %cst_55 {dimension_numbers = #tpu.dot_dimension_numbers<[1], [0], [0], [1], [0, 0, 1, 1], [], []>} : vector<4x8xbf16>, vector<8x512xbf16>, vector<4x512xf32> -> vector<4x512xf32>
    %c0_56 = arith.constant 0 : index
    %c0_57 = arith.constant 0 : index
    %92 = vector.load %arg12[%c0_56, %c0_57] : memref<4x1xf32, #tpu.memory_space<vmem>>, vector<4x1xf32>
    %93 = vector.broadcast %92 : vector<4x1xf32> to vector<4x512xf32>
    %94 = arith.addf %91, %93 : vector<4x512xf32>
    %cst_58 = arith.constant 0.000000e+00 : f32
    %95 = vector.broadcast %cst_58 : f32 to vector<4x512xf32>
    %96 = arith.cmpf oge, %94, %95 : vector<4x512xf32>
    %cst_59 = arith.constant 1.000000e-01 : f32
    %97 = vector.broadcast %cst_59 : f32 to vector<4x512xf32>
    %98 = arith.mulf %97, %94 : vector<4x512xf32>
    %99 = arith.select %96, %94, %98 : vector<4x512xi1>, vector<4x512xf32>
    %c0_60 = arith.constant 0 : index
    %c0_61 = arith.constant 0 : index
    %100 = vector.load %arg13[%c0_60, %c0_61] : memref<8x4xbf16, #tpu.memory_space<vmem>>, vector<8x4xbf16>
    %101 = arith.truncf %88 : vector<4x512xf32> to vector<4x512xbf16>
    %cst_62 = arith.constant dense<0.000000e+00> : vector<8x512xf32>
    %102 = tpu.matmul %100, %101, %cst_62 {dimension_numbers = #tpu.dot_dimension_numbers<[1], [0], [0], [1], [0, 0, 1, 1], [], []>} : vector<8x4xbf16>, vector<4x512xbf16>, vector<8x512xf32> -> vector<8x512xf32>
    %c0_63 = arith.constant 0 : index
    %c0_64 = arith.constant 0 : index
    %103 = vector.load %arg14[%c0_63, %c0_64] : memref<8x4xbf16, #tpu.memory_space<vmem>>, vector<8x4xbf16>
    %104 = arith.truncf %99 : vector<4x512xf32> to vector<4x512xbf16>
    %cst_65 = arith.constant dense<0.000000e+00> : vector<8x512xf32>
    %105 = tpu.matmul %103, %104, %cst_65 {dimension_numbers = #tpu.dot_dimension_numbers<[1], [0], [0], [1], [0, 0, 1, 1], [], []>} : vector<8x4xbf16>, vector<4x512xbf16>, vector<8x512xf32> -> vector<8x512xf32>
    %106 = arith.addf %102, %105 : vector<8x512xf32>
    %c0_66 = arith.constant 0 : index
    %c0_67 = arith.constant 0 : index
    %107 = vector.load %arg15[%c0_66, %c0_67] : memref<8x1xf32, #tpu.memory_space<vmem>>, vector<8x1xf32>
    %108 = vector.broadcast %107 : vector<8x1xf32> to vector<8x512xf32>
    %109 = arith.addf %106, %108 : vector<8x512xf32>
    %cst_68 = arith.constant 0.000000e+00 : f32
    %110 = vector.broadcast %cst_68 : f32 to vector<8x512xf32>
    %111 = arith.cmpf oge, %109, %110 : vector<8x512xf32>
    %cst_69 = arith.constant 0.00999999977 : f32
    %112 = vector.broadcast %cst_69 : f32 to vector<8x512xf32>
    %113 = arith.mulf %112, %109 : vector<8x512xf32>
    %114 = arith.select %111, %109, %113 : vector<8x512xi1>, vector<8x512xf32>
    %c0_70 = arith.constant 0 : index
    %c0_71 = arith.constant 0 : index
    %c0_72 = arith.constant 0 : index
    %115 = vector.load %arg16[%c0_70, %c0_71, %c0_72] : memref<1x8x512xf32, #tpu.memory_space<vmem>>, vector<1x8x512xf32>
    %116 = vector.shape_cast %115 : vector<1x8x512xf32> to vector<8x512xf32>
    %117 = vector.shape_cast %114 : vector<8x512xf32> to vector<1x8x512xf32>
    tpu.vector_store %arg16[%c0_70, %c0_71, %c0_72], %117 {strides = array<i32>} : memref<1x8x512xf32, #tpu.memory_space<vmem>>, vector<1x8x512xf32>,
    return
  }
  func.func @transform_0(%arg0: i32) -> (i32, i32) {
    %c0_i32 = arith.constant 0 : i32
    %c0_i32_0 = arith.constant 0 : i32
    %c0_i32_1 = arith.constant 0 : i32
    return %c0_i32, %c0_i32_0 : i32, i32
  }
  func.func @transform_1(%arg0: i32) -> (i32, i32, i32) {
    %c0_i32 = arith.constant 0 : i32
    %c0_i32_0 = arith.constant 0 : i32
    %c0_i32_1 = arith.constant 0 : i32
    return %arg0, %c0_i32, %c0_i32_0 : i32, i32, i32
  }
  func.func @transform_2(%arg0: i32) -> (i32, i32) {
    %c0_i32 = arith.constant 0 : i32
    %c0_i32_0 = arith.constant 0 : i32
    %c0_i32_1 = arith.constant 0 : i32
    return %c0_i32, %c0_i32_0 : i32, i32
  }
  func.func @transform_3(%arg0: i32) -> (i32, i32) {
    %c0_i32 = arith.constant 0 : i32
    %c0_i32_0 = arith.constant 0 : i32
    %c0_i32_1 = arith.constant 0 : i32
    return %c0_i32, %c0_i32_0 : i32, i32
  }
  func.func @transform_4(%arg0: i32) -> (i32, i32) {
    %c0_i32 = arith.constant 0 : i32
    %c0_i32_0 = arith.constant 0 : i32
    %c0_i32_1 = arith.constant 0 : i32
    return %c0_i32, %c0_i32_0 : i32, i32
  }
  func.func @transform_5(%arg0: i32) -> (i32, i32) {
    %c0_i32 = arith.constant 0 : i32
    %c0_i32_0 = arith.constant 0 : i32
    %c0_i32_1 = arith.constant 0 : i32
    return %c0_i32, %c0_i32_0 : i32, i32
  }
  func.func @transform_6(%arg0: i32) -> (i32, i32) {
    %c0_i32 = arith.constant 0 : i32
    %c0_i32_0 = arith.constant 0 : i32
    %c0_i32_1 = arith.constant 0 : i32
    return %c0_i32, %c0_i32_0 : i32, i32
  }
  func.func @transform_7(%arg0: i32) -> (i32, i32) {
    %c0_i32 = arith.constant 0 : i32
    %c0_i32_0 = arith.constant 0 : i32
    %c0_i32_1 = arith.constant 0 : i32
    return %c0_i32, %c0_i32_0 : i32, i32
  }
  func.func @transform_8(%arg0: i32) -> (i32, i32) {
    %c0_i32 = arith.constant 0 : i32
    %c0_i32_0 = arith.constant 0 : i32
    %c0_i32_1 = arith.constant 0 : i32
    return %c0_i32, %c0_i32_0 : i32, i32
  }
  func.func @transform_9(%arg0: i32) -> (i32, i32) {
    %c0_i32 = arith.constant 0 : i32
    %c0_i32_0 = arith.constant 0 : i32
    %c0_i32_1 = arith.constant 0 : i32
    return %c0_i32, %c0_i32_0 : i32, i32
  }
  func.func @transform_10(%arg0: i32) -> (i32, i32) {
    %c0_i32 = arith.constant 0 : i32
    %c0_i32_0 = arith.constant 0 : i32
    %c0_i32_1 = arith.constant 0 : i32
    return %c0_i32, %c0_i32_0 : i32, i32
  }
  func.func @transform_11(%arg0: i32) -> (i32, i32) {
    %c0_i32 = arith.constant 0 : i32
    %c0_i32_0 = arith.constant 0 : i32
    %c0_i32_1 = arith.constant 0 : i32
    return %c0_i32, %c0_i32_0 : i32, i32
  }
  func.func @transform_12(%arg0: i32) -> (i32, i32) {
    %c0_i32 = arith.constant 0 : i32
    %c0_i32_0 = arith.constant 0 : i32
    %c0_i32_1 = arith.constant 0 : i32
    return %c0_i32, %c0_i32_0 : i32, i32
  }
  func.func @transform_13(%arg0: i32) -> (i32, i32) {
    %c0_i32 = arith.constant 0 : i32
    %c0_i32_0 = arith.constant 0 : i32
    %c0_i32_1 = arith.constant 0 : i32
    return %c0_i32, %c0_i32_0 : i32, i32
  }
  func.func @transform_14(%arg0: i32) -> (i32, i32) {
    %c0_i32 = arith.constant 0 : i32
    %c0_i32_0 = arith.constant 0 : i32
    %c0_i32_1 = arith.constant 0 : i32
    return %c0_i32, %c0_i32_0 : i32, i32
  }
  func.func @transform_15(%arg0: i32) -> (i32, i32, i32) {
    %c0_i32 = arith.constant 0 : i32
    %c0_i32_0 = arith.constant 0 : i32
    %c0_i32_1 = arith.constant 0 : i32
    return %arg0, %c0_i32, %c0_i32_0 : i32, i32, i32
  }
}

</mosaic_0001>

<bundles_post_ra>
// kernel: bottleneck_csp_forward.1
= control target key start
LH: loop header
LB: loop body
LE: loop exit
PB: predicated region body
PF: predicated region fallthrough
CT: control target
= control target key end

     0   :  { %vm70_vm0 = vcmask 1043456   ;;  %v1374_v3 = vmov 0   ;;  %vm66_vm1 = vcmask 64512   ;;  %vm192_vm6 = vcmask 1041408   ;;  %s1376_s30 = smov 16   ;;  %s1377_s16 = smov 15   ;;  %s1758_s1 = inlined_call_operand.vmem [shape: f32[1,8,512], index: 1, kind: input, shape index: {}]   ;;  %s1759_s3 = inlined_call_operand.vmem [shape: f32[4,1], index: 3, kind: input, shape index: {}]   ;;  %s1760_s5 = inlined_call_operand.vmem [shape: f32[2,1], index: 5, kind: input, shape index: {}]   ;;  %s1761_s2 = inlined_call_operand.vmem [shape: bf16[4,8], index: 2, kind: input, shape index: {}]   ;;  %s1762_s4 = inlined_call_operand.vmem [shape: bf16[2,4], index: 4, kind: input, shape index: {}]   ;;  %s1763_s7 = inlined_call_operand.vmem [shape: f32[4,1], index: 7, kind: input, shape index: {}]   ;;  %s1764_s9 = inlined_call_operand.vmem [shape: f32[4,1], index: 9, kind: input, shape index: {}]   ;;  %s1765_s0 = inlined_call_operand.vmem [shape: f32[9,512], index: 0, kind: input, shape index: {}]   ;;  %s1766_s6 = inlined_call_operand.vmem [shape: bf16[4,18], index: 6, kind: input, shape index: {}]   ;;  %s1767_s11 = inlined_call_operand.vmem [shape: f32[4,1], index: 11, kind: input, shape index: {}]   ;;  %s1768_s14 = inlined_call_operand.vmem [shape: f32[8,1], index: 14, kind: input, shape index: {}]   ;;  %s1769_s8 = inlined_call_operand.vmem [shape: bf16[4,4], index: 8, kind: input, shape index: {}]   ;;  %s1770_s10 = inlined_call_operand.vmem [shape: bf16[4,8], index: 10, kind: input, shape index: {}]   ;;  %s1771_s13 = inlined_call_operand.vmem [shape: bf16[8,4], index: 13, kind: input, shape index: {}]   ;;  %s1772_s12 = inlined_call_operand.vmem [shape: bf16[8,4], index: 12, kind: input, shape index: {}]   ;;  %s1773_s15 = inlined_call_operand.vmem [shape: f32[1,8,512], index: 15, kind: output, shape index: {}]  }
   0x1   :  { %v52_v0 = vld [vmem:[%s1758_s1 + $0x8] sm:$0xff]  ;;  %v54_v1 = vld [vmem:[%s1758_s1 + $0x18] sm:$0xff]  ;;  %v51_v2 = vld [vmem:[%s1758_s1] sm:$0xff]  ;;  %115 = vmatprep.mubr.bf16.mxu0 %v1374_v3  ;;  %156 = vmatprep.mubr.bf16.mxu1 %v1374_v3  ;;  %vm188_vm7 = vcmask 31744   ;;  %s1378_s17 = smov 1   ;;  %s1379_s18 = smov 127  }
   0x2   :  { %v1474_v4 = vpack.c.bf16 %v52_v0, %v52_v0  ;;  %v1476_v5 = vpack.c.bf16 %v54_v1, %v54_v1  ;;  %v56_v6 = vpack.c.bf16 %v51_v2, %v51_v2  ;;  %v53_v7 = vld [vmem:[%s1758_s1 + $0x10] sm:$0xff]  ;;  %1372 = vset.pattern.permute.xlu0 %v1374_v3  ;;  %v60_v8 = vld [vmem:[%s1759_s3] sm:$0xf]  ;;  %1373 = vset.pattern.permute.xlu1 %v1374_v3  ;;  %s1380_s19 = smov 113   ;;  %s1381_s20 = smov 112   ;;  %v307_v1 = vlaneseq }
   0x3   :  { %v58_v9 = vpack.c.bf16 %v53_v7, %v53_v7  ;;  %63 = vperm.xlu0 %1372, %v60_v8   ;;  %v182_v11 = vld [vmem:[%s1760_s5] sm:$0x3]  ;;  %s1382_s21 = smov 17   ;;  %vm759_vm14 = vcmask 1040384  }
   0x4   :  { %1328 = vmatprep.subr.msk.bf16.mxu0 %vm70_vm0, %v1474_v4  ;;  %1330 = vmatprep.subr.msk.bf16.mxu1 %vm70_vm0, %v1476_v5  ;;  %v1491_v10 = vsel %vm70_vm0, %v56_v6, 0  ;;  %v55_v13 = vld [vmem:[%s1761_s2] sm:$0x3]  ;;  %v317_v2 = vshrl.u32 %v307_v1, 7  ;;  %v1541_v6 = vand.u32 127, %v307_v1 }
   0x5   :  { %98 = vmatpush1.bf16.msra.mxu0 %v1491_v10  ;;  %v1498_v12 = vsel %vm70_vm0, %v58_v9, 0  ;;  %v177_v41 = vld [vmem:[%s1762_s4] sm:$0x1]  ;;  %s1375_s4 = smov 111  }
   0x6   :  { %139 = vmatpush1.bf16.msra.mxu1 %v1498_v12  ;;  %v749_v63 = vld [vmem:[%s1763_s7] sm:$0xf]  ;;  %v1543_v7 = vsub.s32 0, %v317_v2  ;;  %v1545_v8 = vsub.s32 1, %v317_v2  ;;  %vm692_vm12 = vcmp.lt.s32.totalorder %v1541_v6, 111  ;;  %vm352_vm13 = vcmp.lt.s32.totalorder %v1541_v6, 16 }
   0x7   :  { %185 = vperm.xlu0 %1372, %v182_v11   ;;  %v875_v0 = vld [vmem:[%s1764_s9] sm:$0xf]  ;;  %vm408_vm15 = vcmp.lt.s32.totalorder %v1541_v6, 15 }
   0x8   :  { %1329 = vmatmul.mubr.msk.bf16.vlgmr.msra.gmra.mxu0 %vm66_vm1, %v55_v13  ;;  %v1342_v9 = vld [vmem:[%s1765_s0 + $0x20] ss:$8 sm:$0xf] }
   0x9   :  { %1331 = vmatmul.mubr.msk.bf16.vlgmr.msra.gmra.mxu1 %vm66_vm1, %v55_v13  ;;  %237 = vmatprep.mubr.bf16.mxu0 %v1374_v3 }
   0xa   :  { %278 = vmatprep.mubr.bf16.mxu1 %v1374_v3 }
  0x7e   :  { %v64_v14 = vpop.permute.xlu0 %63 }
  0x82   :  { %v186_v42 = vpop.permute.xlu0 %185 }
  0xc8   :  { %v117_v15 = vpop.f32.mrf.mxu0 }
  0xc9   :  { %v118_v16 = vadd.f32 %v117_v15, %v64_v14  ;;  %v158_v17 = vpop.f32.mrf.mxu1  ;;  %v707_v15 = vrot.slane %v1342_v9, %v1545_v8 }
  0xca   :  { %v159_v18 = vadd.f32 %v158_v17, %v64_v14  ;;  %v119_v19 = vpop.f32.mrf.mxu0  ;;  %v1555_v17 = vsub.s32 3, %v317_v2 }
  0xcb   :  { %vm165_vm2 = vcmp.ge.f32.partialorder %v118_v16, 0.0  ;;  %v169_v20 = vmul.f32 0.01, %v118_v16  ;;  %v120_v21 = vadd.f32 %v119_v19, %v64_v14  ;;  %v160_v22 = vpop.f32.mrf.mxu1 }
  0xcc   :  { %vm167_vm3 = vcmp.ge.f32.partialorder %v159_v18, 0.0  ;;  %v171_v23 = vmul.f32 0.01, %v159_v18  ;;  %v161_v24 = vadd.f32 %v160_v22, %v64_v14  ;;  %v121_v25 = vpop.f32.mrf.mxu0  ;;  %v703_v14 = vrot.slane %v1342_v9, %v1543_v7 }
  0xcd   :  { %v1508_v26 = vsel %vm165_vm2, %v118_v16, %v169_v20  ;;  %vm166_vm4 = vcmp.ge.f32.partialorder %v120_v21, 0.0  ;;  %v170_v27 = vmul.f32 0.01, %v120_v21  ;;  %v162_v28 = vpop.f32.mrf.mxu1  ;;  %v1553_v16 = vsub.s32 2, %v317_v2 }
  0xce   :  { %v1510_v29 = vsel %vm167_vm3, %v159_v18, %v171_v23  ;;  %vm168_vm5 = vcmp.ge.f32.partialorder %v161_v24, 0.0  ;;  %v172_v30 = vmul.f32 0.01, %v161_v24  ;;  %v122_v31 = vpop.f32.mrf.mxu0  ;;  %v178_v32 = vpack.c.bf16 %v1508_v26, %v1508_v26 }
  0xcf   :  { %v1514_v33 = vsel %vm166_vm4, %v120_v21, %v170_v27  ;;  %v163_v34 = vpop.f32.mrf.mxu1  ;;  %v180_v35 = vpack.c.bf16 %v1510_v29, %v1510_v29  ;;  %v715_v25 = vrot.slane %v1342_v9, %v1555_v17  ;;  %v1336_v27 = vld [vmem:[%s1765_s0 + $0x1] ss:$8 sm:$0xf]  ;;  %vm464_vm2 = vcmp.lt.s32.totalorder %v1541_v6, 1 }
  0xd0   :  { %v179_v36 = vpack.c.bf16 %v1514_v33, %v1514_v33  ;;  %v1520_v37 = vsel %vm168_vm5, %v161_v24, %v172_v30  ;;  %v194_v39 = vsel %vm192_vm6, %v178_v32, 0  ;;  %v711_v24 = vrot.slane %v1342_v9, %v1553_v16 }
  0xd1   :  { %v181_v38 = vpack.c.bf16 %v1520_v37, %v1520_v37  ;;  %v200_v40 = vsel %vm192_vm6, %v180_v35, 0  ;;  %vm524_vm3 = vcmp.lt.s32.totalorder %v1541_v6, 127  ;;  %vm580_vm4 = vcmp.lt.s32.totalorder %v1541_v6, 113 }
  0xd2   :  { %1332 = vmatprep.subr.msk.bf16.mxu0 %vm192_vm6, %v179_v36  ;;  %v367_v36 = vrot.slane %v1336_v27, %v1545_v8  ;;  %vm636_vm5 = vcmp.lt.s32.totalorder %v1541_v6, 112 }
  0xd3   :  { %1334 = vmatprep.subr.msk.bf16.mxu1 %vm192_vm6, %v181_v38  ;;  %220 = vmatpush1.bf16.msra.mxu0 %v194_v39  ;;  %v371_v38 = vrot.slane %v1336_v27, %v1553_v16 }
  0xd4   :  { %261 = vmatpush1.bf16.msra.mxu1 %v200_v40 }
  0xd6   :  { %1333 = vmatmul.mubr.msk.bf16.vlgmr.msra.gmra.mxu0 %vm188_vm7, %v177_v41 }
  0xd7   :  { %1335 = vmatmul.mubr.msk.bf16.vlgmr.msra.gmra.mxu1 %vm188_vm7, %v177_v41  ;;  %804 = vmatprep.mubr.bf16.mxu0 %v1374_v3 }
  0xd8   :  { %845 = vmatprep.mubr.bf16.mxu1 %v1374_v3 }
 0x196   :  { %v239_v43 = vpop.f32.mrf.mxu0 }
 0x197   :  { %v240_v44 = vadd.f32 %v239_v43, %v186_v42  ;;  %v280_v45 = vpop.f32.mrf.mxu1 }
 0x198   :  { %v281_v46 = vadd.f32 %v280_v45, %v186_v42  ;;  %v241_v47 = vpop.f32.mrf.mxu0  ;;  %v363_v45 = vrot.slane %v1336_v27, %v1543_v7 }
 0x199   :  { %vm287_vm8 = vcmp.ge.f32.partialorder %v240_v44, 0.0  ;;  %v291_v48 = vmul.f32 0.01, %v240_v44  ;;  %v242_v49 = vadd.f32 %v241_v47, %v186_v42  ;;  %v282_v50 = vpop.f32.mrf.mxu1  ;;  %v1337_v47 = vld [vmem:[%s1765_s0 + $0x2] ss:$8 sm:$0xf] }
 0x19a   :  { %vm289_vm9 = vcmp.ge.f32.partialorder %v281_v46, 0.0  ;;  %v293_v51 = vmul.f32 0.01, %v281_v46  ;;  %v283_v52 = vadd.f32 %v282_v50, %v186_v42  ;;  %v243_v53 = vpop.f32.mrf.mxu0 }
 0x19b   :  { %v295_v54 = vsel %vm287_vm8, %v240_v44, %v291_v48  ;;  %vm288_vm10 = vcmp.ge.f32.partialorder %v242_v49, 0.0  ;;  %v292_v55 = vmul.f32 0.01, %v242_v49  ;;  %v284_v56 = vpop.f32.mrf.mxu1  ;;  %vm309_vm8 = vcmp.lt.s32.totalorder %v1541_v6, 17  ;;  %v740_v6 = vld [vmem:[%s1766_s6] sm:$0x3] }
 0x19c   :  { %512 = vst [vmem:[#allocation2 + $0x50] sm:$0x3] %v295_v54  ;;  %v297_v57 = vsel %vm289_vm9, %v281_v46, %v293_v51  ;;  %vm290_vm11 = vcmp.ge.f32.partialorder %v283_v52, 0.0  ;;  %v294_v58 = vmul.f32 0.01, %v283_v52  ;;  %v244_v59 = vpop.f32.mrf.mxu0  ;;  %684 = vrot.lane.b32.xlu1 %v295_v54, %s1375_s4  ;;  %v375_v46 = vrot.slane %v1336_v27, %v1555_v17 }
 0x19d   :  { %514 = vst [vmem:[#allocation2 + $0x8] sm:$0x3] %v297_v57  ;;  %v296_v60 = vsel %vm288_vm10, %v242_v49, %v292_v55  ;;  %v285_v61 = vpop.f32.mrf.mxu1  ;;  %688 = vrot.lane.b32.xlu0 %v297_v57, %s1375_s4  ;;  %vm755_vm9 = vcmask 146432  }
 0x19e   :  { %513 = vst [vmem:[#allocation2 + $0x20] sm:$0x3] %v296_v60  ;;  %v298_v62 = vsel %vm290_vm11, %v283_v52, %v294_v58  ;;  %v423_v58 = vrot.slane %v1337_v47, %v1545_v8 }
 0x19f   :  { %515 = vst [vmem:[#allocation2 + $0x38] sm:$0x3] %v298_v62 }
 0x1a0   :  { %686 = vrot.lane.b32.xlu1 %v296_v60, %s1375_s4 }
 0x1a1   :  { %344 = vrot.lane.b32.xlu0 %v295_v54, %s1376_s30 }
 0x1a4   :  { %690 = vrot.lane.b32.xlu1 %v298_v62, %s1375_s4 }
 0x1a5   :  { %348 = vrot.lane.b32.xlu0 %v297_v57, %s1376_s30 }
 0x1a8   :  { %346 = vrot.lane.b32.xlu1 %v296_v60, %s1376_s30 }
 0x1a9   :  { %400 = vrot.lane.b32.xlu0 %v295_v54, %s1377_s16 }
 0x1ac   :  { %350 = vrot.lane.b32.xlu1 %v298_v62, %s1376_s30 }
 0x1ad   :  { %404 = vrot.lane.b32.xlu0 %v297_v57, %s1377_s16 }
 0x1b0   :  { %402 = vrot.lane.b32.xlu1 %v296_v60, %s1377_s16 }
 0x1b1   :  { %456 = vrot.lane.b32.xlu0 %v295_v54, %s1378_s17 }
 0x1b4   :  { %406 = vrot.lane.b32.xlu1 %v298_v62, %s1377_s16 }
 0x1b5   :  { %460 = vrot.lane.b32.xlu0 %v297_v57, %s1378_s17 }
 0x1b8   :  { %458 = vrot.lane.b32.xlu1 %v296_v60, %s1378_s17 }
 0x1b9   :  { %516 = vrot.lane.b32.xlu0 %v295_v54, %s1379_s18 }
 0x1bc   :  { %462 = vrot.lane.b32.xlu1 %v298_v62, %s1378_s17 }
 0x1bd   :  { %520 = vrot.lane.b32.xlu0 %v297_v57, %s1379_s18 }
 0x1c0   :  { %518 = vrot.lane.b32.xlu1 %v296_v60, %s1379_s18 }
 0x1c1   :  { %572 = vrot.lane.b32.xlu0 %v295_v54, %s1380_s19 }
 0x1c4   :  { %522 = vrot.lane.b32.xlu1 %v298_v62, %s1379_s18 }
 0x1c5   :  { %576 = vrot.lane.b32.xlu0 %v297_v57, %s1380_s19 }
 0x1c8   :  { %574 = vrot.lane.b32.xlu1 %v296_v60, %s1380_s19 }
 0x1c9   :  { %628 = vrot.lane.b32.xlu0 %v295_v54, %s1381_s20 }
 0x1cc   :  { %578 = vrot.lane.b32.xlu1 %v298_v62, %s1380_s19 }
 0x1cd   :  { %632 = vrot.lane.b32.xlu0 %v297_v57, %s1381_s20 }
 0x1d0   :  { %630 = vrot.lane.b32.xlu1 %v296_v60, %s1381_s20 }
 0x1d1   :  { %299 = vrot.lane.b32.xlu0 %v295_v54, %s1382_s21 }
 0x1d4   :  { %634 = vrot.lane.b32.xlu1 %v298_v62, %s1381_s20 }
 0x1d5   :  { %303 = vrot.lane.b32.xlu0 %v297_v57, %s1382_s21 }
 0x1d8   :  { %301 = vrot.lane.b32.xlu1 %v296_v60, %s1382_s21 }
 0x1d9   :  { %752 = vperm.xlu0 %1372, %v749_v63  }
 0x1dc   :  { %305 = vrot.lane.b32.xlu1 %v298_v62, %s1382_s21  ;;  %v427_v62 = vrot.slane %v1337_v47, %v1553_v16 }
 0x1dd   :  { %878 = vperm.xlu0 %1372, %v875_v0  }
 0x20e   :  { %v685_v11 = vpop.permute.xlu1 %684 }
 0x20f   :  { %v689_v13 = vpop.permute.xlu0 %688 }
 0x212   :  { %v687_v18 = vpop.permute.xlu1 %686 }
 0x213   :  { %v345_v19 = vpop.permute.xlu0 %344  ;;  %v694_v20 = vsel %vm692_vm12, %v687_v18, %v689_v13  ;;  %v695_v21 = vsel %vm692_vm12, %v685_v11, %v687_v18 }
 0x214   :  { %v720_v22 = vmul.f32 %v703_v14, %v695_v21  ;;  %v721_v23 = vmul.f32 %v707_v15, %v694_v20 }
 0x216   :  { %724 = vst [vmem:[#allocation2 + $0x28] sm:$0x3] %v720_v22  ;;  %725 = vst [vmem:[#allocation2 + $0x48] sm:$0x3] %v721_v23  ;;  %v691_v28 = vpop.permute.xlu1 %690  ;;  %v431_v23 = vrot.slane %v1337_v47, %v1555_v17 }
 0x217   :  { %v349_v30 = vpop.permute.xlu0 %348  ;;  %v693_v31 = vsel %vm692_vm12, %v689_v13, %v691_v28  ;;  %v696_v32 = vsel %vm692_vm12, %v691_v28, %v685_v11 }
 0x218   :  { %v722_v34 = vmul.f32 %v711_v24, %v693_v31  ;;  %v723_v35 = vmul.f32 %v715_v25, %v696_v32  ;;  %v1338_v24 = vld [vmem:[%s1765_s0 + $0x3] ss:$8 sm:$0xf] }
 0x21a   :  { %726 = vst [vmem:[#allocation2 + $0x10] sm:$0x3] %v722_v34  ;;  %727 = vst [vmem:[#allocation2 + $0x40] sm:$0x3] %v723_v35  ;;  %v347_v39 = vpop.permute.xlu1 %346 }
 0x21b   :  { %v401_v40 = vpop.permute.xlu0 %400  ;;  %v354_v41 = vsel %vm352_vm13, %v347_v39, %v349_v30  ;;  %v355_v42 = vsel %vm352_vm13, %v345_v19, %v347_v39 }
 0x21c   :  { %v381_v43 = vmul.f32 %v367_v36, %v355_v42  ;;  %v382_v44 = vmul.f32 %v371_v38, %v354_v41  ;;  %v479_v36 = vrot.slane %v1338_v24, %v1545_v8  ;;  %v483_v38 = vrot.slane %v1338_v24, %v1553_v16 }
 0x21d   :  { %v737_v48 = vld [vmem:[#allocation2 + $0x48] sm:$0x3] }
 0x21e   :  { %v736_v49 = vld [vmem:[#allocation2 + $0x28] sm:$0x3]  ;;  %v389_v50 = vrot.slane %v381_v43, 6  ;;  %v390_v51 = vrot.slane %v382_v44, 6  ;;  %v351_v52 = vpop.permute.xlu1 %350  ;;  %v746_v53 = vpack.c.bf16 %v737_v48, %v737_v48  ;;  %v487_v48 = vrot.slane %v1338_v24, %v1555_v17 }
 0x21f   :  { %v745_v54 = vpack.c.bf16 %v736_v49, %v736_v49  ;;  %v405_v55 = vpop.permute.xlu0 %404  ;;  %v353_v56 = vsel %vm352_vm13, %v349_v30, %v351_v52  ;;  %v356_v57 = vsel %vm352_vm13, %v351_v52, %v345_v19  ;;  %v419_v19 = vrot.slane %v1337_v47, %v1543_v7  ;;  %v1339_v49 = vld [vmem:[%s1765_s0 + $0x5] ss:$8 sm:$0xf] }
 0x220   :  { %397 = vst [vmem:[#allocation2] sm:$0xc] %v389_v50  ;;  %398 = vst [vmem:[#allocation2 + $0x58] sm:$0xc] %v390_v51  ;;  %v380_v59 = vmul.f32 %v363_v45, %v356_v57  ;;  %v383_v60 = vmul.f32 %v375_v46, %v353_v56  ;;  %1343 = vmatprep.subr.msk.bf16.mxu0 %vm759_vm14, %v746_v53  ;;  %v475_v47 = vrot.slane %v1338_v24, %v1543_v7 }
 0x221   :  { %v761_v61 = vsel %vm759_vm14, %v745_v54, 0  ;;  %v739_v63 = vld [vmem:[#allocation2 + $0x40] sm:$0x3]  ;;  %v738_v0 = vld [vmem:[#allocation2 + $0x10] sm:$0x3] }
 0x222   :  { %785 = vmatpush1.bf16.msra.mxu0 %v761_v61  ;;  %v388_v1 = vrot.slane %v380_v59, 6  ;;  %v391_v2 = vrot.slane %v383_v60, 6  ;;  %v403_v9 = vpop.permute.xlu1 %402  ;;  %v748_v11 = vpack.c.bf16 %v739_v63, %v739_v63  ;;  %v747_v13 = vpack.c.bf16 %v738_v0, %v738_v0 }
 0x223   :  { %v457_v14 = vpop.permute.xlu0 %456  ;;  %v410_v15 = vsel %vm408_vm15, %v403_v9, %v405_v55  ;;  %v411_v18 = vsel %vm408_vm15, %v401_v40, %v403_v9  ;;  %v539_v59 = vrot.slane %v1339_v49, %v1545_v8 }
 0x224   :  { %396 = vst [vmem:[#allocation2 + $0x30] sm:$0xc] %v388_v1  ;;  %399 = vst [vmem:[#allocation2 + $0x18] sm:$0xc] %v391_v2  ;;  %v437_v20 = vmul.f32 %v423_v58, %v411_v18  ;;  %v438_v21 = vmul.f32 %v427_v62, %v410_v15  ;;  %1345 = vmatprep.subr.msk.bf16.mxu1 %vm759_vm14, %v748_v11  ;;  %v767_v22 = vsel %vm759_vm14, %v747_v13, 0 }
 0x225   :  { %826 = vmatpush1.bf16.msra.mxu1 %v767_v22  ;;  %v535_v58 = vrot.slane %v1339_v49, %v1543_v7  ;;  %v543_v11 = vrot.slane %v1339_v49, %v1553_v16  ;;  %v547_v13 = vrot.slane %v1339_v49, %v1555_v17 }
 0x226   :  { %v445_v25 = vrot.slane %v437_v20, 4  ;;  %v446_v27 = vrot.slane %v438_v21, 4  ;;  %v407_v28 = vpop.permute.xlu1 %406 }
 0x227   :  { %v461_v30 = vpop.permute.xlu0 %460  ;;  %v409_v31 = vsel %vm408_vm15, %v405_v55, %v407_v28  ;;  %v412_v32 = vsel %vm408_vm15, %v407_v28, %v401_v40 }
 0x228   :  { %453 = vst [vmem:[#allocation2] sm:$0x30] %v445_v25  ;;  %454 = vst [vmem:[#allocation2 + $0x58] sm:$0x30] %v446_v27  ;;  %v436_v34 = vmul.f32 %v419_v19, %v412_v32  ;;  %v439_v35 = vmul.f32 %v431_v23, %v409_v31 }
 0x22a   :  { %v444_v39 = vrot.slane %v436_v34, 4  ;;  %v447_v41 = vrot.slane %v439_v35, 4  ;;  %v459_v42 = vpop.permute.xlu1 %458 }
 0x22b   :  { %v517_v43 = vpop.permute.xlu0 %516  ;;  %v466_v44 = vsel %vm464_vm2, %v459_v42, %v461_v30  ;;  %v467_v40 = vsel %vm464_vm2, %v457_v14, %v459_v42  ;;  %v1341_v42 = vld [vmem:[%s1765_s0 + $0x7] ss:$8 sm:$0xf] }
 0x22c   :  { %452 = vst [vmem:[#allocation2 + $0x30] sm:$0x30] %v444_v39  ;;  %455 = vst [vmem:[#allocation2 + $0x18] sm:$0x30] %v447_v41  ;;  %v493_v45 = vmul.f32 %v479_v36, %v467_v40  ;;  %v494_v46 = vmul.f32 %v483_v38, %v466_v44 }
 0x22e   :  { %v501_v50 = vrot.slane %v493_v45, 2  ;;  %v502_v51 = vrot.slane %v494_v46, 2  ;;  %v463_v52 = vpop.permute.xlu1 %462 }
 0x22f   :  { %v521_v53 = vpop.permute.xlu0 %520  ;;  %v465_v54 = vsel %vm464_vm2, %v461_v30, %v463_v52  ;;  %v468_v55 = vsel %vm464_vm2, %v463_v52, %v457_v14  ;;  %v1340_v14 = vld [vmem:[%s1765_s0 + $0x6] ss:$8 sm:$0xf] }
 0x230   :  { %509 = vst [vmem:[#allocation2] sm:$0xc0] %v501_v50  ;;  %510 = vst [vmem:[#allocation2 + $0x58] sm:$0xc0] %v502_v51  ;;  %v492_v56 = vmul.f32 %v475_v47, %v468_v55  ;;  %v495_v57 = vmul.f32 %v487_v48, %v465_v54  ;;  %v591_v25 = vrot.slane %v1340_v14, %v1543_v7 }
 0x231   :  { %v595_v27 = vrot.slane %v1340_v14, %v1545_v8  ;;  %v599_v39 = vrot.slane %v1340_v14, %v1553_v16  ;;  %v603_v41 = vrot.slane %v1340_v14, %v1555_v17  ;;  %v647_v50 = vrot.slane %v1341_v42, %v1543_v7 }
 0x232   :  { %v500_v60 = vrot.slane %v492_v56, 2  ;;  %v503_v61 = vrot.slane %v495_v57, 2  ;;  %v519_v62 = vpop.permute.xlu1 %518  ;;  %v651_v51 = vrot.slane %v1341_v42, %v1545_v8 }
 0x233   :  { %v573_v63 = vpop.permute.xlu0 %572  ;;  %v526_v0 = vsel %vm524_vm3, %v519_v62, %v521_v53  ;;  %v527_v1 = vsel %vm524_vm3, %v517_v43, %v519_v62  ;;  %v314_v62 = vld [vmem:[%s1765_s0] ss:$8 sm:$0xf] }
 0x234   :  { %508 = vst [vmem:[#allocation2 + $0x30] sm:$0xc0] %v500_v60  ;;  %511 = vst [vmem:[#allocation2 + $0x18] sm:$0xc0] %v503_v61  ;;  %v552_v2 = vmul.f32 %v535_v58, %v527_v1  ;;  %v553_v9 = vmul.f32 %v539_v59, %v526_v0  ;;  %v655_v60 = vrot.slane %v1341_v42, %v1553_v16 }
 0x235   :  { %v659_v61 = vrot.slane %v1341_v42, %v1555_v17  ;;  %v323_v14 = vrot.slane %v314_v62, %v1545_v8  ;;  %v331_v8 = vrot.slane %v314_v62, %v1555_v17 }
 0x236   :  { %v560_v15 = vrot.slane %v552_v2, 6  ;;  %v561_v18 = vrot.slane %v553_v9, 6  ;;  %v523_v19 = vpop.permute.xlu1 %522 }
 0x237   :  { %v577_v20 = vpop.permute.xlu0 %576  ;;  %v525_v21 = vsel %vm524_vm3, %v521_v53, %v523_v19  ;;  %v528_v22 = vsel %vm524_vm3, %v523_v19, %v517_v43 }
 0x238   :  { %568 = vst [vmem:[#allocation2 + $0x50] sm:$0xc] %v560_v15  ;;  %569 = vst [vmem:[#allocation2 + $0x20] sm:$0xc] %v561_v18  ;;  %v554_v23 = vmul.f32 %v543_v11, %v525_v21  ;;  %v555_v24 = vmul.f32 %v547_v13, %v528_v22  ;;  %v327_v15 = vrot.slane %v314_v62, %v1553_v16 }
 0x23a   :  { %v562_v28 = vrot.slane %v554_v23, 6  ;;  %v563_v30 = vrot.slane %v555_v24, 6  ;;  %v575_v31 = vpop.permute.xlu1 %574 }
 0x23b   :  { %v629_v32 = vpop.permute.xlu0 %628  ;;  %v582_v34 = vsel %vm580_vm4, %v575_v31, %v577_v20  ;;  %v583_v35 = vsel %vm580_vm4, %v573_v63, %v575_v31 }
 0x23c   :  { %570 = vst [vmem:[#allocation2 + $0x8] sm:$0xc] %v562_v28  ;;  %571 = vst [vmem:[#allocation2 + $0x38] sm:$0xc] %v563_v30  ;;  %v608_v36 = vmul.f32 %v591_v25, %v583_v35  ;;  %v609_v38 = vmul.f32 %v595_v27, %v582_v34  ;;  %v319_v27 = vrot.slane %v314_v62, %v1543_v7 }
 0x23e   :  { %v616_v43 = vrot.slane %v608_v36, 4  ;;  %v617_v44 = vrot.slane %v609_v38, 4  ;;  %v579_v40 = vpop.permute.xlu1 %578 }
 0x23f   :  { %v633_v45 = vpop.permute.xlu0 %632  ;;  %v581_v46 = vsel %vm580_vm4, %v577_v20, %v579_v40  ;;  %v584_v47 = vsel %vm580_vm4, %v579_v40, %v573_v63 }
 0x240   :  { %624 = vst [vmem:[#allocation2 + $0x50] sm:$0x30] %v616_v43  ;;  %625 = vst [vmem:[#allocation2 + $0x20] sm:$0x30] %v617_v44  ;;  %v610_v48 = vmul.f32 %v599_v39, %v581_v46  ;;  %v611_v49 = vmul.f32 %v603_v41, %v584_v47  ;;  %v1298_v46 = vld [vmem:[%s1768_s14] sm:$0xff] }
 0x242   :  { %v618_v52 = vrot.slane %v610_v48, 4  ;;  %v619_v53 = vrot.slane %v611_v49, 4  ;;  %v631_v54 = vpop.permute.xlu1 %630 }
 0x243   :  { %v638_v55 = vsel %vm636_vm5, %v631_v54, %v633_v45  ;;  %v639_v56 = vsel %vm636_vm5, %v629_v32, %v631_v54  ;;  %v300_v57 = vpop.permute.xlu0 %299 }
 0x244   :  { %626 = vst [vmem:[#allocation2 + $0x8] sm:$0x30] %v618_v52  ;;  %627 = vst [vmem:[#allocation2 + $0x38] sm:$0x30] %v619_v53  ;;  %v664_v58 = vmul.f32 %v647_v50, %v639_v56  ;;  %v665_v59 = vmul.f32 %v651_v51, %v638_v55 }
 0x246   :  { %v672_v63 = vrot.slane %v664_v58, 2  ;;  %v673_v0 = vrot.slane %v665_v59, 2  ;;  %v635_v1 = vpop.permute.xlu1 %634 }
 0x247   :  { %v637_v2 = vsel %vm636_vm5, %v633_v45, %v635_v1  ;;  %v640_v9 = vsel %vm636_vm5, %v635_v1, %v629_v32  ;;  %v304_v18 = vpop.permute.xlu0 %303  ;;  %v991_v45 = vld [vmem:[%s1767_s11] sm:$0xf] }
 0x248   :  { %680 = vst [vmem:[#allocation2 + $0x50] sm:$0xc0] %v672_v63  ;;  %681 = vst [vmem:[#allocation2 + $0x20] sm:$0xc0] %v673_v0  ;;  %v666_v11 = vmul.f32 %v655_v60, %v637_v2  ;;  %v667_v13 = vmul.f32 %v659_v61, %v640_v9  ;;  %994 = vperm.xlu1 %1373, %v991_v45  }
 0x24a   :  { %v674_v19 = vrot.slane %v666_v11, 2  ;;  %v675_v20 = vrot.slane %v667_v13, 2  ;;  %v302_v21 = vpop.permute.xlu1 %301 }
 0x24b   :  { %v311_v22 = vsel %vm309_vm8, %v302_v21, %v304_v18  ;;  %v312_v23 = vsel %vm309_vm8, %v300_v57, %v302_v21 }
 0x24c   :  { %682 = vst [vmem:[#allocation2 + $0x8] sm:$0xc0] %v674_v19  ;;  %683 = vst [vmem:[#allocation2 + $0x38] sm:$0xc0] %v675_v20  ;;  %v337_v24 = vmul.f32 %v323_v14, %v312_v23  ;;  %v338_v25 = vmul.f32 %v327_v15, %v311_v22  ;;  %1301 = vperm.xlu1 %1373, %v1298_v46  }
 0x24e   :  { %341 = vst [vmem:[#allocation2] sm:$0x3] %v337_v24  ;;  %342 = vst [vmem:[#allocation2 + $0x58] sm:$0x3] %v338_v25  ;;  %v306_v16 = vpop.permute.xlu1 %305 }
 0x24f   :  { %v310_v28 = vsel %vm309_vm8, %v304_v18, %v306_v16  ;;  %v313_v30 = vsel %vm309_vm8, %v306_v16, %v300_v57  ;;  %v733_v35 = vld [vmem:[#allocation2 + $0x20] sm:$0xff]  ;;  %v732_v7 = vld [vmem:[#allocation2 + $0x50] sm:$0xff] }
 0x250   :  { %v336_v31 = vmul.f32 %v319_v27, %v313_v30  ;;  %v339_v32 = vmul.f32 %v331_v8, %v310_v28 }
 0x252   :  { %340 = vst [vmem:[#allocation2 + $0x30] sm:$0x3] %v336_v31  ;;  %343 = vst [vmem:[#allocation2 + $0x18] sm:$0x3] %v339_v32 }
 0x253   :  { %v735_v41 = vld [vmem:[#allocation2 + $0x38] sm:$0xff]  ;;  %v734_v44 = vld [vmem:[#allocation2 + $0x8] sm:$0xff] }
 0x254   :  { %v753_v47 = vpop.permute.xlu0 %752 }
 0x255   :  { %v729_v34 = vld [vmem:[#allocation2] sm:$0xff]  ;;  %v730_v38 = vld [vmem:[#allocation2 + $0x58] sm:$0xff] }
 0x256   :  { %v742_v36 = vpack.c.bf16 %v733_v35, %v729_v34  ;;  %v743_v40 = vpack.c.bf16 %v734_v44, %v730_v38 }
 0x258   :  { %786 = vmatprep.subr.bf16.mxu0 %v742_v36 }
 0x259   :  { %v728_v17 = vld [vmem:[#allocation2 + $0x30] sm:$0xff]  ;;  %v731_v39 = vld [vmem:[#allocation2 + $0x18] sm:$0xff] }
 0x25a   :  { %v741_v42 = vpack.c.bf16 %v732_v7, %v728_v17  ;;  %v744_v43 = vpack.c.bf16 %v735_v41, %v731_v39 }
 0x25c   :  { %787 = vmatpush1.bf16.msra.mxu0 %v741_v42  ;;  %827 = vmatprep.subr.bf16.mxu1 %v744_v43 }
 0x25d   :  { %828 = vmatpush1.bf16.msra.mxu1 %v743_v40 }
 0x25f   :  { %1344 = vmatmul.mubr.msk.bf16.vlgmr.msra.gmra.mxu0 %vm755_vm9, %v740_v6 }
 0x260   :  { %1346 = vmatmul.mubr.msk.bf16.vlgmr.msra.gmra.mxu1 %vm755_vm9, %v740_v6  ;;  %928 = vmatprep.mubr.bf16.mxu0 %v1374_v3 }
 0x261   :  { %969 = vmatprep.mubr.bf16.mxu1 %v1374_v3 }
 0x2c3   :  { %v995_v28 = vpop.permute.xlu1 %994 }
 0x31f   :  { %v806_v48 = vpop.f32.mrf.mxu0 }
 0x320   :  { %v807_v49 = vadd.f32 %v806_v48, %v753_v47  ;;  %v847_v50 = vpop.f32.mrf.mxu1 }
 0x321   :  { %v848_v51 = vadd.f32 %v847_v50, %v753_v47  ;;  %v808_v52 = vpop.f32.mrf.mxu0 }
 0x322   :  { %vm854_vm10 = vcmp.ge.f32.partialorder %v807_v49, 0.0  ;;  %v858_v53 = vmul.f32 0.01, %v807_v49  ;;  %v809_v54 = vadd.f32 %v808_v52, %v753_v47  ;;  %v849_v55 = vpop.f32.mrf.mxu1 }
 0x323   :  { %vm856_vm11 = vcmp.ge.f32.partialorder %v848_v51, 0.0  ;;  %v860_v56 = vmul.f32 0.01, %v848_v51  ;;  %v850_v57 = vadd.f32 %v849_v55, %v753_v47  ;;  %v810_v58 = vpop.f32.mrf.mxu0 }
 0x324   :  { %v862_v59 = vsel %vm854_vm10, %v807_v49, %v858_v53  ;;  %vm855_vm12 = vcmp.ge.f32.partialorder %v809_v54, 0.0  ;;  %v859_v60 = vmul.f32 0.01, %v809_v54  ;;  %v851_v61 = vpop.f32.mrf.mxu1 }
 0x325   :  { %v864_v62 = vsel %vm856_vm11, %v848_v51, %v860_v56  ;;  %vm857_vm13 = vcmp.ge.f32.partialorder %v850_v57, 0.0  ;;  %v861_v63 = vmul.f32 0.01, %v850_v57  ;;  %v811_v0 = vpop.f32.mrf.mxu0  ;;  %v866_v1 = vadd.f32 %v862_v59, %v1508_v26 }
 0x326   :  { %v863_v2 = vsel %vm855_vm12, %v809_v54, %v859_v60  ;;  %v852_v9 = vpop.f32.mrf.mxu1  ;;  %v868_v11 = vadd.f32 %v864_v62, %v1510_v29  ;;  %v870_v29 = vld [vmem:[%s1769_s8] sm:$0x3] }
 0x327   :  { %v867_v13 = vadd.f32 %v863_v2, %v1514_v33  ;;  %v865_v14 = vsel %vm857_vm13, %v850_v57, %v861_v63  ;;  %v871_v15 = vpack.c.bf16 %v866_v1, %v866_v1  ;;  %v990_v33 = vld [vmem:[%s1770_s10] sm:$0x3] }
 0x328   :  { %v869_v18 = vadd.f32 %v865_v14, %v1520_v37  ;;  %v873_v19 = vpack.c.bf16 %v868_v11, %v868_v11  ;;  %v879_v37 = vpop.permute.xlu0 %878 }
 0x329   :  { %v872_v20 = vpack.c.bf16 %v867_v13, %v867_v13  ;;  %v885_v22 = vsel %vm192_vm6, %v871_v15, 0  ;;  %v1099_v13 = vld [vmem:[%s1771_s13] sm:$0xf] }
 0x32a   :  { %v874_v21 = vpack.c.bf16 %v869_v18, %v869_v18  ;;  %v891_v26 = vsel %vm192_vm6, %v873_v19, 0  ;;  %v1094_v18 = vld [vmem:[%s1772_s12] sm:$0xf] }
 0x32b   :  { %1347 = vmatprep.subr.msk.bf16.mxu0 %vm192_vm6, %v872_v20 }
 0x32c   :  { %911 = vmatpush1.bf16.msra.mxu0 %v885_v22  ;;  %1349 = vmatprep.subr.msk.bf16.mxu1 %vm192_vm6, %v874_v21 }
 0x32d   :  { %952 = vmatpush1.bf16.msra.mxu1 %v891_v26  ;;  %1351 = vmatprep.subr.msk.bf16.mxu0 %vm70_vm0, %v1474_v4 }
 0x32e   :  { %1353 = vmatprep.subr.msk.bf16.mxu1 %vm70_vm0, %v1476_v5 }
 0x32f   :  { %1348 = vmatmul.mubr.msk.bf16.vlgmr.msra.gmra.mxu0 %vm188_vm7, %v870_v29 }
 0x330   :  { %1350 = vmatmul.mubr.msk.bf16.vlgmr.msra.gmra.mxu1 %vm188_vm7, %v870_v29  ;;  %1015 = vmatpush1.bf16.msra.mxu0 %v1491_v10 }
 0x331   :  { %1056 = vmatpush1.bf16.msra.mxu1 %v1498_v12  ;;  %1032 = vmatprep.mubr.bf16.mxu0 %v1374_v3 }
 0x332   :  { %1073 = vmatprep.mubr.bf16.mxu1 %v1374_v3 }
 0x337   :  { %1352 = vmatmul.mubr.msk.bf16.vlgmr.msra.gmra.mxu0 %vm66_vm1, %v990_v33 }
 0x338   :  { %1354 = vmatmul.mubr.msk.bf16.vlgmr.msra.gmra.mxu1 %vm66_vm1, %v990_v33  ;;  %1151 = vmatprep.mubr.bf16.mxu0 %v1374_v3 }
 0x339   :  { %1192 = vmatprep.mubr.bf16.mxu1 %v1374_v3 }
 0x3ef   :  { %v930_v4 = vpop.f32.mrf.mxu0 }
 0x3f0   :  { %v971_v5 = vpop.f32.mrf.mxu1  ;;  %v931_v24 = vadd.f32 %v930_v4, %v879_v37 }
 0x3f1   :  { %v932_v10 = vpop.f32.mrf.mxu0  ;;  %v972_v27 = vadd.f32 %v971_v5, %v879_v37 }
 0x3f2   :  { %v973_v12 = vpop.f32.mrf.mxu1  ;;  %v933_v8 = vadd.f32 %v932_v10, %v879_v37  ;;  %vm978_vm0 = vcmp.ge.f32.partialorder %v931_v24, 0.0  ;;  %v982_v34 = vmul.f32 0.1, %v931_v24 }
 0x3f3   :  { %v934_v23 = vpop.f32.mrf.mxu0  ;;  %v974_v31 = vadd.f32 %v973_v12, %v879_v37  ;;  %vm980_vm1 = vcmp.ge.f32.partialorder %v972_v27, 0.0  ;;  %v984_v7 = vmul.f32 0.1, %v972_v27 }
 0x3f4   :  { %v975_v25 = vpop.f32.mrf.mxu1  ;;  %vm979_vm14 = vcmp.ge.f32.partialorder %v933_v8, 0.0  ;;  %v983_v39 = vmul.f32 0.1, %v933_v8  ;;  %v986_v53 = vsel %vm978_vm0, %v931_v24, %v982_v34 }
 0x3f5   :  { %v935_v16 = vpop.f32.mrf.mxu0  ;;  %v985_v44 = vmul.f32 0.1, %v974_v31  ;;  %vm981_vm3 = vcmp.ge.f32.partialorder %v974_v31, 0.0  ;;  %v988_v58 = vsel %vm980_vm1, %v972_v27, %v984_v7  ;;  %v1095_v63 = vpack.c.bf16 %v986_v53, %v986_v53 }
 0x3f6   :  { %v976_v30 = vpop.f32.mrf.mxu1  ;;  %v987_v54 = vsel %vm979_vm14, %v933_v8, %v983_v39  ;;  %v1097_v2 = vpack.c.bf16 %v988_v58, %v988_v58 }
 0x3f7   :  { %v1034_v32 = vpop.f32.mrf.mxu0  ;;  %v989_v59 = vsel %vm981_vm3, %v974_v31, %v985_v44  ;;  %v1096_v0 = vpack.c.bf16 %v987_v54, %v987_v54  ;;  %v1205_v14 = vsel %vm192_vm6, %v1095_v63, 0 }
 0x3f8   :  { %v1035_v35 = vadd.f32 %v1034_v32, %v995_v28  ;;  %v1075_v36 = vpop.f32.mrf.mxu1  ;;  %v1098_v9 = vpack.c.bf16 %v989_v59, %v989_v59  ;;  %v1211_v15 = vsel %vm192_vm6, %v1097_v2, 0 }
 0x3f9   :  { %v1076_v38 = vadd.f32 %v1075_v36, %v995_v28  ;;  %v1036_v17 = vpop.f32.mrf.mxu0 }
 0x3fa   :  { %vm1082_vm15 = vcmp.ge.f32.partialorder %v1035_v35, 0.0  ;;  %v1086_v41 = vmul.f32 0.1, %v1035_v35  ;;  %v1037_v42 = vadd.f32 %v1036_v17, %v995_v28  ;;  %v1077_v43 = vpop.f32.mrf.mxu1 }
 0x3fb   :  { %vm1084_vm2 = vcmp.ge.f32.partialorder %v1076_v38, 0.0  ;;  %v1088_v40 = vmul.f32 0.1, %v1076_v38  ;;  %v1078_v6 = vadd.f32 %v1077_v43, %v995_v28  ;;  %v1038_v45 = vpop.f32.mrf.mxu0 }
 0x3fc   :  { %v1090_v46 = vsel %vm1082_vm15, %v1035_v35, %v1086_v41  ;;  %vm1083_vm4 = vcmp.ge.f32.partialorder %v1037_v42, 0.0  ;;  %v1087_v47 = vmul.f32 0.1, %v1037_v42  ;;  %v1079_v48 = vpop.f32.mrf.mxu1 }
 0x3fd   :  { %v1100_v49 = vpack.c.bf16 %v1090_v46, %v1090_v46  ;;  %v1092_v50 = vsel %vm1084_vm2, %v1076_v38, %v1088_v40  ;;  %vm1085_vm5 = vcmp.ge.f32.partialorder %v1078_v6, 0.0  ;;  %v1089_v51 = vmul.f32 0.1, %v1078_v6  ;;  %v1039_v52 = vpop.f32.mrf.mxu0 }
 0x3fe   :  { %v1102_v55 = vpack.c.bf16 %v1092_v50, %v1092_v50  ;;  %v1091_v56 = vsel %vm1083_vm4, %v1037_v42, %v1087_v47  ;;  %v1080_v57 = vpop.f32.mrf.mxu1 }
 0x3ff   :  { %v1101_v60 = vpack.c.bf16 %v1091_v56, %v1091_v56  ;;  %v1093_v61 = vsel %vm1085_vm5, %v1078_v6, %v1089_v51  ;;  %v1108_v1 = vsel %vm192_vm6, %v1100_v49, 0 }
 0x400   :  { %v1103_v62 = vpack.c.bf16 %v1093_v61, %v1093_v61  ;;  %v1114_v11 = vsel %vm192_vm6, %v1102_v55, 0 }
 0x401   :  { %1355 = vmatprep.subr.msk.bf16.mxu0 %vm192_vm6, %v1101_v60 }
 0x402   :  { %1134 = vmatpush1.bf16.msra.mxu0 %v1108_v1  ;;  %1357 = vmatprep.subr.msk.bf16.mxu1 %vm192_vm6, %v1103_v62 }
 0x403   :  { %1175 = vmatpush1.bf16.msra.mxu1 %v1114_v11  ;;  %1359 = vmatprep.subr.msk.bf16.mxu0 %vm192_vm6, %v1096_v0 }
 0x404   :  { %1361 = vmatprep.subr.msk.bf16.mxu1 %vm192_vm6, %v1098_v9 }
 0x405   :  { %1356 = vmatmul.mubr.msk.bf16.vlgmr.msra.gmra.mxu0 %vm188_vm7, %v1099_v13 }
 0x406   :  { %1358 = vmatmul.mubr.msk.bf16.vlgmr.msra.gmra.mxu1 %vm188_vm7, %v1099_v13  ;;  %1231 = vmatpush1.bf16.msra.mxu0 %v1205_v14 }
 0x407   :  { %1272 = vmatpush1.bf16.msra.mxu1 %v1211_v15  ;;  %1248 = vmatprep.mubr.bf16.mxu0 %v1374_v3 }
 0x408   :  { %1289 = vmatprep.mubr.bf16.mxu1 %v1374_v3  ;;  %v1302_v3 = vpop.permute.xlu1 %1301 }
 0x40d   :  { %1360 = vmatmul.mubr.msk.bf16.vlgmr.msra.gmra.mxu0 %vm188_vm7, %v1094_v18 }
 0x40e   :  { %1362 = vmatmul.mubr.msk.bf16.vlgmr.msra.gmra.mxu1 %vm188_vm7, %v1094_v18 }
 0x4c5   :  { %v1153_v19 = vpop.f32.mrf.mxu0 }
 0x4c6   :  { %v1194_v20 = vpop.f32.mrf.mxu1 }
 0x4c7   :  { %v1155_v21 = vpop.f32.mrf.mxu0 }
 0x4c8   :  { %v1196_v22 = vpop.f32.mrf.mxu1 }
 0x4c9   :  { %v1157_v26 = vpop.f32.mrf.mxu0 }
 0x4ca   :  { %v1198_v29 = vpop.f32.mrf.mxu1 }
 0x4cb   :  { %v1158_v33 = vpop.f32.mrf.mxu0 }
 0x4cc   :  { %v1199_v4 = vpop.f32.mrf.mxu1 }
 0x4cd   :  { %v1250_v5 = vpop.f32.mrf.mxu0 }
 0x4ce   :  { %v1251_v10 = vadd.f32 %v1250_v5, %v1153_v19  ;;  %v1291_v12 = vpop.f32.mrf.mxu1 }
 0x4cf   :  { %v1292_v37 = vadd.f32 %v1291_v12, %v1194_v20  ;;  %v1252_v23 = vpop.f32.mrf.mxu0 }
 0x4d0   :  { %v1304_v24 = vadd.f32 %v1302_v3, %v1251_v10  ;;  %v1253_v25 = vadd.f32 %v1252_v23, %v1155_v21  ;;  %v1293_v27 = vpop.f32.mrf.mxu1 }
 0x4d1   :  { %v1306_v8 = vadd.f32 %v1302_v3, %v1292_v37  ;;  %v1294_v16 = vadd.f32 %v1293_v27, %v1196_v22  ;;  %v1254_v28 = vpop.f32.mrf.mxu0 }
 0x4d2   :  { %vm1308_vm6 = vcmp.ge.f32.partialorder %v1304_v24, 0.0  ;;  %v1312_v30 = vmul.f32 0.01, %v1304_v24  ;;  %v1305_v31 = vadd.f32 %v1302_v3, %v1253_v25  ;;  %v1295_v32 = vpop.f32.mrf.mxu1 }
 0x4d3   :  { %vm1310_vm7 = vcmp.ge.f32.partialorder %v1306_v8, 0.0  ;;  %v1314_v34 = vmul.f32 0.01, %v1306_v8  ;;  %v1307_v35 = vadd.f32 %v1302_v3, %v1294_v16  ;;  %v1255_v36 = vpop.f32.mrf.mxu0 }
 0x4d4   :  { %v1316_v7 = vsel %vm1308_vm6, %v1304_v24, %v1312_v30  ;;  %vm1309_vm8 = vcmp.ge.f32.partialorder %v1305_v31, 0.0  ;;  %v1313_v38 = vmul.f32 0.01, %v1305_v31  ;;  %v1296_v17 = vpop.f32.mrf.mxu1 }
 0x4d5   :  { %1320 = vst [vmem:[%s1773_s15] sm:$0xff] %v1316_v7  ;;  %v1318_v39 = vsel %vm1310_vm7, %v1306_v8, %v1314_v34  ;;  %vm1311_vm9 = vcmp.ge.f32.partialorder %v1307_v35, 0.0  ;;  %v1315_v41 = vmul.f32 0.01, %v1307_v35 }
 0x4d6   :  { %1322 = vst [vmem:[%s1773_s15 + $0x10] sm:$0xff] %v1318_v39  ;;  %v1317_v42 = vsel %vm1309_vm8, %v1305_v31, %v1313_v38 }
 0x4d7   :  { %1321 = vst [vmem:[%s1773_s15 + $0x8] sm:$0xff] %v1317_v42  ;;  %v1319_v43 = vsel %vm1311_vm9, %v1307_v35, %v1315_v41 }
 0x4d8   :  { %1323 = vst [vmem:[%s1773_s15 + $0x18] sm:$0xff] %v1319_v43 }

</bundles_post_ra>
